<compile_context>
chip_gen: v6e
topology: v6e:2x2x1
jax: 0.10.0
libtpu: 0.0.40
codegen_flags: <defaults>
</compile_context>

<pallas_src>
import math

import jax
import jax.numpy as jnp
from jax.experimental import pallas as pl
from jax.experimental.pallas import tpu as pltpu


_MAX_TILE_BYTES = 2 * 1024 * 1024          # ~2 MiB block -> <=8 MiB live buffers
_LANE_CANDIDATES = (1024, 512, 256, 128)   # lane-dense last-dim widths
_ROW_TILE_CANDIDATES = (1024, 512, 256, 128, 64, 32, 16, 8)


def _elu_plus_one_kernel(x_ref, o_ref):
    # elementwise hot path: elu(x) + 1 == where(x > 0, x + 1, exp(x))
    x = x_ref[...].astype(jnp.float32)
    # Clamp the exp argument so the unselected branch never produces inf.
    y = jnp.where(x > 0.0, x + 1.0, jnp.exp(jnp.minimum(x, 0.0)))
    o_ref[...] = y.astype(o_ref.dtype)


def _choose_tiling(total_elems, itemsize):
    """Pick (lane_width W, row_tile TR, padded_rows R_pad) for a flat tensor."""
    # 1) Lane-dense width: largest candidate that divides the element count.
    lane_w = None
    for cand in _LANE_CANDIDATES:
        if total_elems % cand == 0:
            lane_w = cand
            break
    if lane_w is None:
        lane_w = 128                      # ragged fallback (needs a pad copy)
    rows = pl.cdiv(total_elems, lane_w)

    # 2) Largest row tile that divides the row count and keeps a block small
    #    enough for VMEM double-buffering on all of v5e/v6e/v7x.
    max_rows = max(8, _MAX_TILE_BYTES // (lane_w * itemsize))
    tile_rows = None
    for cand in _ROW_TILE_CANDIDATES:
        if cand <= max_rows and rows % cand == 0:
            tile_rows = cand
            break
    if tile_rows is None:
        if rows <= max_rows:
            tile_rows = rows              # single full-extent block
        else:
            tile_rows = min(512, max_rows)  # rare: pad rows up to a multiple

    rows_pad = pl.cdiv(rows, tile_rows) * tile_rows
    return lane_w, tile_rows, rows_pad


def _elu_plus_one(x):
    """Apply elu(x) + 1 elementwise via a lane-dense tiled Pallas kernel."""
    orig_shape = x.shape
    total = math.prod(orig_shape)
    if total == 0:
        return x

    lane_w, tile_rows, rows_pad = _choose_tiling(total, x.dtype.itemsize)
    padded_total = rows_pad * lane_w

    flat = x.reshape(-1)
    if padded_total != total:
        # Ragged fallback only; the common attention-tensor shapes hit the
        # no-copy path above.
        flat = jnp.pad(flat, (0, padded_total - total))
    x2d = flat.reshape(rows_pad, lane_w)

    out = pl.pallas_call(
        _elu_plus_one_kernel,
        out_shape=jax.ShapeDtypeStruct((rows_pad, lane_w), x.dtype),
        grid_spec=pltpu.PrefetchScalarGridSpec(
            num_scalar_prefetch=0,
            grid=(rows_pad // tile_rows,),
            in_specs=[pl.BlockSpec((tile_rows, lane_w), lambda i: (i, 0))],
            out_specs=pl.BlockSpec((tile_rows, lane_w), lambda i: (i, 0)),
        ),
        compiler_params=pltpu.CompilerParams(
            dimension_semantics=("parallel",)),   # shards across v7x's 2 TCs
    )(x2d)

    if padded_total != total:
        return out.reshape(-1)[:total].reshape(orig_shape)
    return out.reshape(orig_shape)


class FeatureMap:
    """JAX/Pallas port of the fast_transformers FeatureMap interface,
    specialized to the canonical elu(x)+1 feature map."""

    def __init__(self, query_dims):
        self.query_dims = query_dims

    def new_feature_map(self, device=None, dtype=None):
        # elu feature map has no random parameters; nothing to sample.
        return None

    def forward_queries(self, x):
        return self(x)

    def forward_keys(self, x):
        return self(x)

    def __call__(self, x):
        return self.forward(x)

    def forward(self, x):
        assert x.shape[-1] == self.query_dims, (
            f"expected trailing dim {self.query_dims}, got {x.shape[-1]}")
        return _elu_plus_one(x)

    @classmethod
    def factory(cls, *args, **kwargs):
        def inner(query_dims):
            return cls(query_dims, *args, **kwargs)
        return inner


if __name__ == "__main__":
    key = jax.random.PRNGKey(0)

    def ref_fn(x):
        xf = x.astype(jnp.float32)
        return jnp.where(xf > 0, xf + 1.0, jnp.exp(xf)).astype(x.dtype)

    # (batch, seq_len, heads, query_dims) -- fast_transformers Q/K convention.
    #  1) small canonical shape (single block, full-extent rows)
    #  2) larger shape exercising the multi-step pipelined grid path
    #  3) odd shape exercising the ragged pad/slice fallback
    shapes = [(2, 8, 4, 32), (4, 512, 8, 64), (3, 5, 2, 7)]

    for idx, shp in enumerate(shapes):
        E = shp[-1]
        feature_map_factory = FeatureMap.factory()
        fm = feature_map_factory(E)
        fm.new_feature_map(dtype=jnp.float32)

        x = jax.random.normal(jax.random.fold_in(key, idx), shp,
                              dtype=jnp.float32) * 3.0

        q = fm.forward_queries(x)
        k = fm.forward_keys(x)
        jax.block_until_ready(q)
        jax.block_until_ready(k)

        ref = ref_fn(x)
        assert q.shape == x.shape and q.dtype == x.dtype
        assert jnp.allclose(q, ref, atol=1e-6, rtol=1e-6), f"query mismatch {shp}"
        assert jnp.allclose(k, ref, atol=1e-6, rtol=1e-6), f"key mismatch {shp}"

    print("KERNEL_OK")
</pallas_src>

<mosaic_0001>
module attributes {stable_mosaic.version = 11 : i64} {
  func.func @_elu_plus_one_kernel(%arg0: i32, %arg1: memref<2x1024xf32, #tpu.memory_space<vmem>>, %arg2: memref<2x1024xf32, #tpu.memory_space<vmem>>) attributes {dimension_semantics = [#tpu.dimension_semantics<parallel>], iteration_bounds = array<i64: 1>, scalar_prefetch = 0 : i64, scratch_operands = 0 : i64, tpu.core_type = #tpu.core_type<tc>, window_params = [{transform_indices = @transform_0, window_bounds = array<i64: 2, 1024>}, {transform_indices = @transform_1, window_bounds = array<i64: 2, 1024>}]} {
    %c0 = arith.constant 0 : index
    %c0_0 = arith.constant 0 : index
    %0 = vector.load %arg1[%c0, %c0_0] : memref<2x1024xf32, #tpu.memory_space<vmem>>, vector<2x1024xf32>
    %cst = arith.constant 0.000000e+00 : f32
    %1 = vector.broadcast %cst : f32 to vector<2x1024xf32>
    %2 = arith.cmpf ogt, %0, %1 : vector<2x1024xf32>
    %cst_1 = arith.constant 1.000000e+00 : f32
    %3 = vector.broadcast %cst_1 : f32 to vector<2x1024xf32>
    %4 = arith.addf %0, %3 : vector<2x1024xf32>
    %cst_2 = arith.constant 0.000000e+00 : f32
    %5 = vector.broadcast %cst_2 : f32 to vector<2x1024xf32>
    %6 = arith.minimumf %0, %5 : vector<2x1024xf32>
    %7 = math.exp %6 : vector<2x1024xf32>
    %8 = arith.select %2, %4, %7 : vector<2x1024xi1>, vector<2x1024xf32>
    %c0_3 = arith.constant 0 : index
    %c0_4 = arith.constant 0 : index
    %9 = vector.load %arg2[%c0_3, %c0_4] : memref<2x1024xf32, #tpu.memory_space<vmem>>, vector<2x1024xf32>
    tpu.vector_store %arg2[%c0_3, %c0_4], %8 {strides = array<i32>} : memref<2x1024xf32, #tpu.memory_space<vmem>>, vector<2x1024xf32>,
    return
  }
  func.func @transform_0(%arg0: i32) -> (i32, i32) {
    %c0_i32 = arith.constant 0 : i32
    %c0_i32_0 = arith.constant 0 : i32
    return %arg0, %c0_i32 : i32, i32
  }
  func.func @transform_1(%arg0: i32) -> (i32, i32) {
    %c0_i32 = arith.constant 0 : i32
    %c0_i32_0 = arith.constant 0 : i32
    return %arg0, %c0_i32 : i32, i32
  }
}

</mosaic_0001>

<bundles_post_ra>
// kernel: tpu_custom_call.1
= control target key start
LH: loop header
LB: loop body
LE: loop exit
PB: predicated region body
PF: predicated region fallthrough
CT: control target
= control target key end

     0   :  { %6 = vsyncpa [#allocation3], 0  ;;  %s120_s0 = inlined_call_operand.hbm [shape: f32[2,1024], index: 0, kind: input, shape index: {}]   ;;  %s121_s1 = inlined_call_operand.hbm [shape: f32[2,1024], index: 1, kind: output, shape index: {}]  }
   0x1   :  { %7 = vsyncpa [#allocation4], 0  ;;  %s102_s6 = smov [#allocation2]  }
   0x2   :  { %s14_s7 = sshll.u32 %s102_s6, 4  ;;  %s15_s7 = int_to_ptr.vmem [resolvable:$true] %s14_s7 }
   0x3   :  { %s66_s8 = scalar_lea.vmem %s15_s7, 256  ;;  %p71_p1 = scmp.lt.s32.totalorder %s15_s7, %s15_s7 }
   0x4   :  { %p67_p0 = scmp.ne.s32.totalorder %s15_s7, %s66_s8  ;;  %p72_p2 = scmp.lt.s32.totalorder %s66_s8, %s66_s8 }
   0x6   :  { %p73_p3 = por %p72_p2, %p71_p1 }
   0x8   :  { %p74_p4 = pnand %p73_p3, %p67_p0 }
   0xa   :  { %77 = shalt.err (!%p74_p4)
}
   0xb   :  { %17 = dma.hbm_to_vmem [thread:$0]  %s120_s0, 256, %s15_s7, [#allocation3]  }
   0xc   :  { %98 = dma.done.wait [#allocation3], 256  }
   0xd   :  { %99 = vsyncadd [#allocation3], 4294967040  ;;  %v21_v0 = vld [vmem:[#allocation2] sm:$0xff]  ;;  %v22_v1 = vld [vmem:[#allocation2 + $0x8] sm:$0xff]  ;;  %s103_s11 = smov [#allocation5]  }
   0xe   :  { %v27_v2 = vmin.f32 %v21_v0, 0.0  ;;  %v28_v3 = vmin.f32 %v22_v1, 0.0  ;;  %v25_v6 = vadd.f32 1.0, %v21_v0  ;;  %vm23_vm0 = vcmp.gt.f32.partialorder %v21_v0, 0.0  ;;  %s43_s12 = sshll.u32 %s103_s11, 4  ;;  %s44_s12 = int_to_ptr.vmem [resolvable:$true] %s43_s12 }
   0xf   :  { %v26_v7 = vadd.f32 1.0, %v22_v1  ;;  %vm24_vm1 = vcmp.gt.f32.partialorder %v22_v1, 0.0  ;;  %s78_s0 = scalar_lea.vmem %s44_s12, 256  ;;  %p83_p6 = scmp.lt.s32.totalorder %s44_s12, %s44_s12 }
  0x10   :  { %v29_v4 = vmul.f32 1.442695, %v27_v2  ;;  %v31_v5 = vmul.f32 1.442695, %v28_v3  ;;  %p79_p5 = scmp.ne.s32.totalorder %s44_s12, %s78_s0  ;;  %p84_p7 = scmp.lt.s32.totalorder %s78_s0, %s78_s0 }
  0x12   :  { %54 = vpow2.f32 %v29_v4  ;;  %p85_p8 = por %p84_p7, %p83_p6 }
  0x13   :  { %56 = vpow2.f32 %v31_v5 }
  0x14   :  { %p86_p9 = pnand %p85_p8, %p79_p5 }
  0x1f   :  { %v55_v8 = vpop.eup %54 }
  0x20   :  { %v57_v9 = vpop.eup %56  ;;  %v33_v10 = vsel %vm23_vm0, %v25_v6, %v55_v8 }
  0x21   :  { %35 = vst [vmem:[#allocation5] sm:$0xff] %v33_v10  ;;  %v34_v11 = vsel %vm24_vm1, %v26_v7, %v57_v9 }
  0x22   :  { %36 = vst [vmem:[#allocation5 + $0x8] sm:$0xff] %v34_v11 }
  0x23   :  { %89 = shalt.err (!%p86_p9)
}
  0x24   :  { %46 = dma.vmem_to_hbm [thread:$0]  %s44_s12, 256, %s121_s1, [#allocation4]  }
  0x25   :  { %100 = dma.done.wait [#allocation4], 256  }
  0x26   :  { %101 = vsyncadd [#allocation4], 4294967040 }
  0x27   :  { %50 = vsyncpa [#allocation3], 1 }
  0x28   :  { %51 = vsyncpa [#allocation4], 1 }

</bundles_post_ra>
